<compile_context>
chip_gen: v7x
topology: tpu7x:2x2x1
jax: 0.10.0
libtpu: 0.0.40
codegen_flags: <defaults>
</compile_context>

<pallas_src>
import functools

import jax
import jax.numpy as jnp
from jax.experimental import pallas as pl
from jax.experimental.pallas import tpu as pltpu


# ---------------------------------------------------------------------------
# Kernels
# ---------------------------------------------------------------------------

def _layer_norm_epilogue(z, gamma, beta, *, d_model, eps):
    # post LayerNorm: gamma * (z - mean) / (std + eps) + beta, Bessel-corrected std
    mean = jnp.mean(z, axis=-1, keepdims=True)
    d = z - mean
    var = jnp.sum(d * d, axis=-1, keepdims=True) * (1.0 / (d_model - 1))
    inv = pl.reciprocal(jnp.sqrt(var) + eps, approx=True)   # (tm,1) on the EUP slot
    return gamma * d * inv + beta


def ffn_resident_kernel(x_ref, w1_ref, b1_ref, w2_ref, b2_ref, gamma_ref, beta_ref,
                        o_ref, *, d_model, eps, compute_dtype):
    """Weights fully VMEM-resident (constant index_map); single row-tile grid axis."""
    xb = x_ref[...]                                          # original precision
    h = jnp.dot(xb.astype(compute_dtype), w1_ref[...],
                preferred_element_type=jnp.float32)
    h = jnp.maximum(h + b1_ref[...], 0.0)
    y = jnp.dot(h.astype(w2_ref.dtype), w2_ref[...],
                preferred_element_type=jnp.float32)
    z = xb.astype(jnp.float32) + y + b2_ref[...]             # residual add + fc2 bias
    o_ref[...] = _layer_norm_epilogue(z, gamma_ref[...], beta_ref[...],
                                      d_model=d_model, eps=eps).astype(o_ref.dtype)


def ffn_streamed_kernel(x_ref, w1_ref, b1_ref, w2_ref, b2_ref, gamma_ref, beta_ref,
                        o_ref, acc_ref, *, d_model, eps, compute_dtype):
    """Weights streamed over a trailing d_hidden reduction axis (f32 VMEM accumulator)."""
    k = pl.program_id(1)

    @pl.when(k == 0)
    def _init():
        acc_ref[...] = jnp.zeros_like(acc_ref)

    # fc1 chunk over this d_hidden block (bf16 operands, f32 accumulation) + ReLU
    h = jnp.dot(x_ref[...].astype(compute_dtype), w1_ref[...],
                preferred_element_type=jnp.float32)
    h = jnp.maximum(h + b1_ref[...], 0.0)

    # fc2 chunk: partial contribution of this hidden block to the output rows
    acc_ref[...] += jnp.dot(h.astype(w2_ref.dtype), w2_ref[...],
                            preferred_element_type=jnp.float32)

    @pl.when(k == pl.num_programs(1) - 1)
    def _finalize():
        z = x_ref[...].astype(jnp.float32) + acc_ref[...] + b2_ref[...]
        o_ref[...] = _layer_norm_epilogue(z, gamma_ref[...], beta_ref[...],
                                          d_model=d_model, eps=eps).astype(o_ref.dtype)


# ---------------------------------------------------------------------------
# Wrapper
# ---------------------------------------------------------------------------

def _round_up(x, m):
    return (x + m - 1) // m * m


def _pick_tile(total, target, granule):
    """Largest multiple of `granule` <= target that divides `total`."""
    t = min(target, total)
    t -= t % granule
    t = max(t, granule)
    while total % t != 0:
        t -= granule
    return t


def _vmem_limit_bytes():
    """Per-generation scoped VMEM limit: physical capacity minus headroom."""
    try:
        cap = int(pltpu.get_tpu_info().vmem_capacity_bytes)
    except Exception:
        cap = 64 * 1024 * 1024           # conservative default (v7x per-TC size)
    return max(32 * 1024 * 1024, min(int(cap * 0.85), cap - (8 << 20)))


def feed_forward_block(x, w1, b1, w2, b2, gamma, beta, *, eps=1e-6,
                       tile_rows=512, block_hidden=512,
                       compute_dtype=jnp.bfloat16, weights_resident=None):
    """x: [..., d_model]; w1: [d_model, d_hidden]; w2: [d_hidden, d_model];
    b1: [d_hidden]/(1,d_hidden); b2, gamma, beta: [d_model]/(1,d_model).
    Weights should already be in `compute_dtype` (cast once at parameter init)."""
    orig_shape = x.shape
    orig_dtype = x.dtype
    d_model = x.shape[-1]
    d_hidden = w1.shape[1]

    # Lane-dense output slab + (8,128)-friendly tiling.
    assert d_model % 128 == 0, "d_model must be a multiple of 128 (pad upstream)"
    assert d_hidden % 128 == 0, "d_hidden must be a multiple of 128 (pad upstream)"

    x2 = x.reshape(-1, d_model)           # no dtype cast in the wrapper
    n_rows = x2.shape[0]

    # Weights: prefer pre-casting at init time; only cast here as a fallback.
    if w1.dtype != compute_dtype:
        w1 = w1.astype(compute_dtype)
    if w2.dtype != compute_dtype:
        w2 = w2.astype(compute_dtype)

    b1f = b1.reshape(1, d_hidden).astype(jnp.float32)
    b2f = b2.reshape(1, d_model).astype(jnp.float32)
    gf = gamma.reshape(1, d_model).astype(jnp.float32)
    bf = beta.reshape(1, d_model).astype(jnp.float32)

    vmem_limit = _vmem_limit_bytes()
    x_item = jnp.dtype(orig_dtype).itemsize
    w_item = jnp.dtype(compute_dtype).itemsize
    weight_bytes = 2 * d_model * d_hidden * w_item

    # Row tile: feed the MXU M dim, but keep >=2 row blocks (v7x dual TensorCores),
    # and pad rows up to a tile multiple so tm never degenerates.
    tm = max(8, _round_up(min(tile_rows, n_rows), 8))
    if n_rows > 8 and -(-n_rows // tm) < 2:
        tm = max(8, _round_up(-(-n_rows // 2), 8))
    n_pad = _round_up(n_rows, tm)
    if n_pad != n_rows:
        x2 = jnp.pad(x2, ((0, n_pad - n_rows), (0, 0)))
    n_row_blocks = n_pad // tm

    if weights_resident is None:
        # Conservative estimate: weights possibly double-buffered, pipelined x/out
        # tiles, f32 h / LN intermediates, plus headroom for Mosaic scratch.
        resident_need = (2 * weight_bytes
                         + 2 * tm * d_model * x_item          # x tiles
                         + 2 * tm * d_model * x_item          # out tiles
                         + tm * d_hidden * 4                  # f32 h
                         + 2 * tm * d_model * 4)              # f32 z / LN temps
        weights_resident = resident_need <= vmem_limit - (8 << 20)

    cost = pl.CostEstimate(
        flops=int(4 * n_pad * d_model * d_hidden),
        transcendentals=int(n_pad),
        bytes_accessed=int(2 * n_pad * d_model * x_item
                           + (1 if weights_resident else n_row_blocks) * weight_bytes
                           + (d_hidden + 3 * d_model) * 4),
    )

    if weights_resident:
        kernel = functools.partial(ffn_resident_kernel, d_model=d_model, eps=eps,
                                   compute_dtype=compute_dtype)
        grid_spec = pltpu.PrefetchScalarGridSpec(
            num_scalar_prefetch=0,
            grid=(n_row_blocks,),
            in_specs=[
                pl.BlockSpec((tm, d_model), lambda i: (i, 0)),          # x rows
                pl.BlockSpec((d_model, d_hidden), lambda i: (0, 0)),    # W1 (resident)
                pl.BlockSpec((1, d_hidden), lambda i: (0, 0)),          # b1
                pl.BlockSpec((d_hidden, d_model), lambda i: (0, 0)),    # W2 (resident)
                pl.BlockSpec((1, d_model), lambda i: (0, 0)),           # b2
                pl.BlockSpec((1, d_model), lambda i: (0, 0)),           # gamma
                pl.BlockSpec((1, d_model), lambda i: (0, 0)),           # beta
            ],
            out_specs=pl.BlockSpec((tm, d_model), lambda i: (i, 0)),
        )
        dim_sem = ("parallel",)
    else:
        tk = _pick_tile(d_hidden, block_hidden, 128)                    # hidden reduction tile
        kernel = functools.partial(ffn_streamed_kernel, d_model=d_model, eps=eps,
                                   compute_dtype=compute_dtype)
        grid_spec = pltpu.PrefetchScalarGridSpec(
            num_scalar_prefetch=0,
            grid=(n_row_blocks, d_hidden // tk),                        # reduction axis last
            in_specs=[
                pl.BlockSpec((tm, d_model), lambda i, k: (i, 0)),       # x rows (resident over k)
                pl.BlockSpec((d_model, tk), lambda i, k: (0, k)),       # W1 hidden block
                pl.BlockSpec((1, tk),       lambda i, k: (0, k)),       # b1 hidden block
                pl.BlockSpec((tk, d_model), lambda i, k: (k, 0)),       # W2 hidden block
                pl.BlockSpec((1, d_model),  lambda i, k: (0, 0)),       # b2
                pl.BlockSpec((1, d_model),  lambda i, k: (0, 0)),       # gamma
                pl.BlockSpec((1, d_model),  lambda i, k: (0, 0)),       # beta
            ],
            out_specs=pl.BlockSpec((tm, d_model), lambda i, k: (i, 0)),
            scratch_shapes=[pltpu.VMEM((tm, d_model), jnp.float32)],    # f32 accumulator
        )
        dim_sem = ("parallel", "arbitrary")

    out2 = pl.pallas_call(
        kernel,
        out_shape=jax.ShapeDtypeStruct((n_pad, d_model), orig_dtype),
        grid_spec=grid_spec,
        compiler_params=pltpu.CompilerParams(
            dimension_semantics=dim_sem,
            vmem_limit_bytes=vmem_limit,
        ),
        cost_estimate=cost,
    )(x2, w1, b1f, w2, b2f, gf, bf)

    if n_pad != n_rows:
        out2 = out2[:n_rows]
    return out2.reshape(orig_shape)


# ---------------------------------------------------------------------------
# Reference + demo
# ---------------------------------------------------------------------------

def init_linear_params(key, fan_in, fan_out):
    """PyTorch nn.Linear-style uniform init; weight returned as (in, out)."""
    kw, kb = jax.random.split(key)
    bound = 1.0 / (fan_in ** 0.5)
    w = jax.random.uniform(kw, (fan_in, fan_out), jnp.float32, -bound, bound)
    b = jax.random.uniform(kb, (1, fan_out), jnp.float32, -bound, bound)
    return w, b


def reference(x2, w1c, b1, w2c, b2, gamma, beta, *, eps=1e-6):
    """Pure-JAX reference mirroring the kernel's precision: original-precision residual,
    low-precision dot operands, f32 accumulation."""
    h = jnp.dot(x2.astype(w1c.dtype), w1c, preferred_element_type=jnp.float32)
    h = jnp.maximum(h + b1.reshape(1, -1).astype(jnp.float32), 0.0)
    y = jnp.dot(h.astype(w2c.dtype), w2c, preferred_element_type=jnp.float32)
    z = x2.astype(jnp.float32) + y + b2.reshape(1, -1).astype(jnp.float32)
    mean = jnp.mean(z, axis=-1, keepdims=True)
    d = z - mean
    var = jnp.sum(d * d, axis=-1, keepdims=True) / (z.shape[-1] - 1)
    out = gamma.reshape(1, -1) * d / (jnp.sqrt(var) + eps) + beta.reshape(1, -1)
    return out.astype(x2.dtype)


if __name__ == "__main__":
    key = jax.random.PRNGKey(0)
    k_x, k_l1, k_l2 = jax.random.split(key, 3)

    # Small but lane-dense shapes (d_model / d_hidden multiples of 128/256).
    batch, seq, d_model, d_hidden = 2, 8, 256, 512

    x = jax.random.normal(k_x, (batch, seq, d_model), jnp.float32)
    w1, b1 = init_linear_params(k_l1, d_model, d_hidden)
    w2, b2 = init_linear_params(k_l2, d_hidden, d_model)
    gamma = jnp.ones((d_model,), jnp.float32)   # LayerNorm.gamma
    beta = jnp.zeros((d_model,), jnp.float32)   # LayerNorm.beta

    # Cast weights to the MXU compute dtype ONCE, at parameter-setup time.
    w1c = w1.astype(jnp.bfloat16)
    w2c = w2.astype(jnp.bfloat16)

    ref = reference(x.reshape(-1, d_model), w1c, b1, w2c, b2, gamma, beta)
    ref = ref.reshape(x.shape)

    # Path A: weight-resident layout (auto-selected for these shapes).
    out_a = feed_forward_block(x, w1c, b1, w2c, b2, gamma, beta)
    jax.block_until_ready(out_a)
    err_a = float(jnp.max(jnp.abs(out_a - ref)))
    assert jnp.allclose(out_a, ref, atol=2e-2, rtol=2e-2), \
        f"resident path mismatch vs reference, max_err={err_a}"

    # Path B: streamed-weight fallback with the d_hidden reduction axis (forced,
    # to validate the layout used when weights do not fit VMEM).
    out_b = feed_forward_block(x, w1c, b1, w2c, b2, gamma, beta,
                               weights_resident=False, block_hidden=256)
    jax.block_until_ready(out_b)
    err_b = float(jnp.max(jnp.abs(out_b - ref)))
    assert jnp.allclose(out_b, ref, atol=2e-2, rtol=2e-2), \
        f"streamed path mismatch vs reference, max_err={err_b}"

    print("KERNEL_OK")
</pallas_src>

<mosaic_0001>
module attributes {stable_mosaic.version = 11 : i64} {
  func.func @ffn_resident_kernel(%arg0: i32, %arg1: memref<8x256xf32, #tpu.memory_space<vmem>>, %arg2: memref<256x512xbf16, #tpu.memory_space<vmem>>, %arg3: memref<1x512xf32, #tpu.memory_space<vmem>>, %arg4: memref<512x256xbf16, #tpu.memory_space<vmem>>, %arg5: memref<1x256xf32, #tpu.memory_space<vmem>>, %arg6: memref<1x256xf32, #tpu.memory_space<vmem>>, %arg7: memref<1x256xf32, #tpu.memory_space<vmem>>, %arg8: memref<8x256xf32, #tpu.memory_space<vmem>>) attributes {dimension_semantics = [#tpu.dimension_semantics<parallel>], iteration_bounds = array<i64: 2>, scalar_prefetch = 0 : i64, scratch_operands = 0 : i64, tpu.core_type = #tpu.core_type<tc>, window_params = [{transform_indices = @transform_0, window_bounds = array<i64: 8, 256>}, {pipeline_mode = #tpu.pipeline_mode<synchronous>, transform_indices = @transform_1, window_bounds = array<i64: 256, 512>}, {pipeline_mode = #tpu.pipeline_mode<synchronous>, transform_indices = @transform_2, window_bounds = array<i64: 1, 512>}, {pipeline_mode = #tpu.pipeline_mode<synchronous>, transform_indices = @transform_3, window_bounds = array<i64: 512, 256>}, {pipeline_mode = #tpu.pipeline_mode<synchronous>, transform_indices = @transform_4, window_bounds = array<i64: 1, 256>}, {pipeline_mode = #tpu.pipeline_mode<synchronous>, transform_indices = @transform_5, window_bounds = array<i64: 1, 256>}, {pipeline_mode = #tpu.pipeline_mode<synchronous>, transform_indices = @transform_6, window_bounds = array<i64: 1, 256>}, {transform_indices = @transform_7, window_bounds = array<i64: 8, 256>}]} {
    %c0 = arith.constant 0 : index
    %c0_0 = arith.constant 0 : index
    %0 = vector.load %arg1[%c0, %c0_0] : memref<8x256xf32, #tpu.memory_space<vmem>>, vector<8x256xf32>
    %1 = arith.truncf %0 : vector<8x256xf32> to vector<8x256xbf16>
    %c0_1 = arith.constant 0 : index
    %c0_2 = arith.constant 0 : index
    %2 = vector.load %arg2[%c0_1, %c0_2] : memref<256x512xbf16, #tpu.memory_space<vmem>>, vector<256x512xbf16>
    %cst = arith.constant dense<0.000000e+00> : vector<8x512xf32>
    %3 = tpu.matmul %1, %2, %cst {dimension_numbers = #tpu.dot_dimension_numbers<[1], [0], [0], [1], [0, 0, 1, 1], [], []>} : vector<8x256xbf16>, vector<256x512xbf16>, vector<8x512xf32> -> vector<8x512xf32>
    %c0_3 = arith.constant 0 : index
    %c0_4 = arith.constant 0 : index
    %4 = vector.load %arg3[%c0_3, %c0_4] : memref<1x512xf32, #tpu.memory_space<vmem>>, vector<1x512xf32>
    %5 = vector.broadcast %4 : vector<1x512xf32> to vector<8x512xf32>
    %6 = arith.addf %3, %5 : vector<8x512xf32>
    %cst_5 = arith.constant 0.000000e+00 : f32
    %7 = vector.broadcast %cst_5 : f32 to vector<8x512xf32>
    %8 = arith.maximumf %6, %7 : vector<8x512xf32>
    %9 = arith.truncf %8 : vector<8x512xf32> to vector<8x512xbf16>
    %c0_6 = arith.constant 0 : index
    %c0_7 = arith.constant 0 : index
    %10 = vector.load %arg4[%c0_6, %c0_7] : memref<512x256xbf16, #tpu.memory_space<vmem>>, vector<512x256xbf16>
    %cst_8 = arith.constant dense<0.000000e+00> : vector<8x256xf32>
    %11 = tpu.matmul %9, %10, %cst_8 {dimension_numbers = #tpu.dot_dimension_numbers<[1], [0], [0], [1], [0, 0, 1, 1], [], []>} : vector<8x512xbf16>, vector<512x256xbf16>, vector<8x256xf32> -> vector<8x256xf32>
    %12 = arith.addf %0, %11 : vector<8x256xf32>
    %c0_9 = arith.constant 0 : index
    %c0_10 = arith.constant 0 : index
    %13 = vector.load %arg5[%c0_9, %c0_10] : memref<1x256xf32, #tpu.memory_space<vmem>>, vector<1x256xf32>
    %14 = vector.broadcast %13 : vector<1x256xf32> to vector<8x256xf32>
    %15 = arith.addf %12, %14 : vector<8x256xf32>
    %c0_11 = arith.constant 0 : index
    %c0_12 = arith.constant 0 : index
    %16 = vector.load %arg6[%c0_11, %c0_12] : memref<1x256xf32, #tpu.memory_space<vmem>>, vector<1x256xf32>
    %c0_13 = arith.constant 0 : index
    %c0_14 = arith.constant 0 : index
    %17 = vector.load %arg7[%c0_13, %c0_14] : memref<1x256xf32, #tpu.memory_space<vmem>>, vector<1x256xf32>
    %cst_15 = arith.constant dense<0.000000e+00> : vector<8xf32>
    %18 = vector.multi_reduction <add>, %15, %cst_15 [1] : vector<8x256xf32> to vector<8xf32>
    %19 = vector.shape_cast %18 : vector<8xf32> to vector<8x1xf32>
    %cst_16 = arith.constant 2.560000e+02 : f32
    %20 = vector.broadcast %cst_16 : f32 to vector<8x1xf32>
    %21 = arith.divf %19, %20 : vector<8x1xf32>
    %22 = vector.broadcast %21 : vector<8x1xf32> to vector<8x256xf32>
    %23 = arith.subf %15, %22 : vector<8x256xf32>
    %24 = arith.mulf %23, %23 : vector<8x256xf32>
    %cst_17 = arith.constant dense<0.000000e+00> : vector<8xf32>
    %25 = vector.multi_reduction <add>, %24, %cst_17 [1] : vector<8x256xf32> to vector<8xf32>
    %26 = vector.shape_cast %25 : vector<8xf32> to vector<8x1xf32>
    %cst_18 = arith.constant 0.00392156886 : f32
    %27 = vector.broadcast %cst_18 : f32 to vector<8x1xf32>
    %28 = arith.mulf %26, %27 : vector<8x1xf32>
    %29 = math.sqrt %28 : vector<8x1xf32>
    %cst_19 = arith.constant 9.99999997E-7 : f32
    %30 = vector.broadcast %cst_19 : f32 to vector<8x1xf32>
    %31 = arith.addf %29, %30 : vector<8x1xf32>
    %32 = tpu.reciprocal %31 {approx = true} : vector<8x1xf32> -> vector<8x1xf32>
    %33 = vector.broadcast %16 : vector<1x256xf32> to vector<8x256xf32>
    %34 = arith.mulf %33, %23 : vector<8x256xf32>
    %35 = vector.broadcast %32 : vector<8x1xf32> to vector<8x256xf32>
    %36 = arith.mulf %34, %35 : vector<8x256xf32>
    %37 = vector.broadcast %17 : vector<1x256xf32> to vector<8x256xf32>
    %38 = arith.addf %36, %37 : vector<8x256xf32>
    %c0_20 = arith.constant 0 : index
    %c0_21 = arith.constant 0 : index
    %39 = vector.load %arg8[%c0_20, %c0_21] : memref<8x256xf32, #tpu.memory_space<vmem>>, vector<8x256xf32>
    tpu.vector_store %arg8[%c0_20, %c0_21], %38 {strides = array<i32>} : memref<8x256xf32, #tpu.memory_space<vmem>>, vector<8x256xf32>,
    return
  }
  func.func @transform_0(%arg0: i32) -> (i32, i32) {
    %c0_i32 = arith.constant 0 : i32
    %c0_i32_0 = arith.constant 0 : i32
    return %arg0, %c0_i32 : i32, i32
  }
  func.func @transform_1(%arg0: i32) -> (i32, i32) {
    %c0_i32 = arith.constant 0 : i32
    %c0_i32_0 = arith.constant 0 : i32
    %c0_i32_1 = arith.constant 0 : i32
    return %c0_i32, %c0_i32_0 : i32, i32
  }
  func.func @transform_2(%arg0: i32) -> (i32, i32) {
    %c0_i32 = arith.constant 0 : i32
    %c0_i32_0 = arith.constant 0 : i32
    %c0_i32_1 = arith.constant 0 : i32
    return %c0_i32, %c0_i32_0 : i32, i32
  }
  func.func @transform_3(%arg0: i32) -> (i32, i32) {
    %c0_i32 = arith.constant 0 : i32
    %c0_i32_0 = arith.constant 0 : i32
    %c0_i32_1 = arith.constant 0 : i32
    return %c0_i32, %c0_i32_0 : i32, i32
  }
  func.func @transform_4(%arg0: i32) -> (i32, i32) {
    %c0_i32 = arith.constant 0 : i32
    %c0_i32_0 = arith.constant 0 : i32
    %c0_i32_1 = arith.constant 0 : i32
    return %c0_i32, %c0_i32_0 : i32, i32
  }
  func.func @transform_5(%arg0: i32) -> (i32, i32) {
    %c0_i32 = arith.constant 0 : i32
    %c0_i32_0 = arith.constant 0 : i32
    %c0_i32_1 = arith.constant 0 : i32
    return %c0_i32, %c0_i32_0 : i32, i32
  }
  func.func @transform_6(%arg0: i32) -> (i32, i32) {
    %c0_i32 = arith.constant 0 : i32
    %c0_i32_0 = arith.constant 0 : i32
    %c0_i32_1 = arith.constant 0 : i32
    return %c0_i32, %c0_i32_0 : i32, i32
  }
  func.func @transform_7(%arg0: i32) -> (i32, i32) {
    %c0_i32 = arith.constant 0 : i32
    %c0_i32_0 = arith.constant 0 : i32
    return %arg0, %c0_i32 : i32, i32
  }
}

</mosaic_0001>

<bundles_post_ra>
// kernel: tpu_custom_call.1
= control target key start
LH: loop header
LB: loop body
LE: loop exit
PB: predicated region body
PF: predicated region fallthrough
CT: control target
= control target key end

     0   :  { %12 = vsyncpa [#allocation3], 0  ;;  %s2356_s0 = inlined_call_operand.hbm [shape: f32[16,256], index: 0, kind: input, shape index: {}]   ;;  %s2357_s1 = inlined_call_operand.hbm [shape: bf16[256,512], index: 1, kind: input, shape index: {}]   ;;  %s2358_s2 = inlined_call_operand.vmem [shape: f32[1,512], index: 2, kind: input, shape index: {}]   ;;  %s2359_s3 = inlined_call_operand.hbm [shape: bf16[512,256], index: 3, kind: input, shape index: {}]   ;;  %s2360_s4 = inlined_call_operand.vmem [shape: f32[1,256], index: 4, kind: input, shape index: {}]   ;;  %s2361_s5 = inlined_call_operand.vmem [shape: f32[1,256], index: 5, kind: input, shape index: {}]   ;;  %s2362_s6 = inlined_call_operand.vmem [shape: f32[1,256], index: 6, kind: input, shape index: {}]   ;;  %s2363_s7 = inlined_call_operand.hbm [shape: f32[16,256], index: 7, kind: output, shape index: {}]  }
   0x1   :  { %14 = vsyncpa [#allocation3 + $0x1], 0 }
   0x2   :  { %15 = vsyncpa [#allocation6], 0 }
   0x3   :  { %16 = vsyncpa [#allocation4], 0 }
   0x4   :  { %18 = vsyncpa [#allocation4 + $0x1], 0  ;;  %s2085_s24 = smov 0   ;;  %s2087_s25 = smov 0  }
   0x5   :  { %s2089_s26 = smov 0   ;;  %s2091_s27 = smov 0  }
   0x6 LB: > { %s2106_s28 = sadd.s32 4294967295, %s2035_s27   ;;  %s1464_s29 = sadd.s32 4294967294, %s2035_s27   ;;  %s2035_s27 = sphi %s2091_s27, %s2383_s27   ;;  %s2031_s26 = sphi %s2089_s26, %s2382_s26   ;;  %s2027_s25 = sphi %s2087_s25, %s2381_s25   ;;  %s2023_s24 = sphi %s2085_s24, %s2380_s24  }
   0x7   : > { %p44_p0 = scmp.ne.s32.totalorder %s2027_s25, %s2023_s24  ;;  %p2364_p1 = scmp.eq.s32.totalorder %s2106_s28, 0 }
   0x8   : > { %p200_p3 = scmp.eq.s32.totalorder %s1464_s29, 1  ;;  %p1465_p5 = scmp.ge.s32.totalorder %s2035_s27, 1 }
   0x9   : > { %p2115_p4 = por %p2364_p1, %p44_p0  ;;  %p207_p7 = scmp.lt.s32.totalorder %s2035_s27, 3 }
   0xa   : > { %p2120_p6 = por %p200_p3, %p44_p0  ;;  %s2037_s10 = smov [#allocation5]  }
   0xb   : > { %s2367_s30 = scalar_select %p2115_p4, 1, 0 }
   0xc   : > { %s2368_s8 = scalar_select %p2120_p6, 1, 0 }
   0xd   : > { %p2125_p8 = pnand %p1465_p5, %p207_p7  ;;  %s219_s11 = sshll.u32 %s2037_s10, 4  ;;  %s2129_s11 = int_to_ptr.vmem [resolvable:$true] %s219_s11 }
   0xe   : > { %s2038_s13 = smov [#allocation7]   ;;  %s1879_s17 = scalar_lea.hbm %s2357_s1, 8192 }
   0xf   : > { %p1624_p9 = pneg %p2125_p8  ;;  %s235_s14 = sshll.u32 %s2038_s13, 4  ;;  %s2140_s14 = int_to_ptr.vmem [resolvable:$true] %s235_s14 }
  0x10   : > { %p1880_p12 = scmp.ne.s32.totalorder %s2357_s1, %s1879_s17  ;;  %p1886_p5 = scmp.lt.u32.totalorder %s1879_s17, %s2357_s1 }
  0x11   : > { %p2136_p11 = pnand %p1624_p9, %p2364_p1 }
  0x13   : > { %p1881_p13 = pneg %p2136_p11 }
  0x15   : > { %p1882_p0 = pnand %p1881_p13, %p1880_p12 }
  0x17   : > { %p1883_p3 = pneg %p1882_p0 }
  0x19   : > { %p1888_p7 = pnand %p1886_p5, %p1883_p3 }
  0x1b   : > { %1891 = shalt.err (!%p1888_p7)
}
  0x1c   : > { %s1892_s22 = scalar_lea.vmem %s2129_s11, 8192  ;;  %p1900_p2 = scmp.lt.s32.totalorder %s2129_s11, %s2129_s11 }
  0x1d   : > { %p1893_p9 = scmp.ne.s32.totalorder %s2129_s11, %s1892_s22  ;;  %p1901_p12 = scmp.lt.s32.totalorder %s1892_s22, %s1892_s22 }
  0x1f   : > { %p1895_p10 = pnand %p1893_p9, %p1881_p13  ;;  %p1902_p0 = por %p1901_p12, %p1900_p2 }
  0x21   : > { %p1896_p1 = pneg %p1895_p10 }
  0x23   : > { %p1903_p6 = pnand %p1902_p0, %p1896_p1 }
  0x25   : > { %1906 = shalt.err (!%p1903_p6)
}
  0x26   : > { %s2039_s23 = smov 256   ;;  %s2040_s29 = smov 16  }
  0x27   : > { %1627 = dma.hbm_to_vmem [thread:$0]  (!%p2136_p11), %s2357_s1, 8192, %s2129_s11, [#allocation6], %s2039_s23, %s2039_s23, %s2040_s29  }
  0x28   : > { %s1907_s17 = scalar_lea.hbm %s2359_s3, 8192 }
  0x29   : > { %p1908_p2 = scmp.ne.s32.totalorder %s2359_s3, %s1907_s17  ;;  %p1914_p10 = scmp.lt.u32.totalorder %s1907_s17, %s2359_s3 }
  0x2b   : > { %p1910_p1 = pnand %p1908_p2, %p1881_p13 }
  0x2d   : > { %p1911_p6 = pneg %p1910_p1 }
  0x2f   : > { %p1916_p3 = pnand %p1914_p10, %p1911_p6 }
  0x31   : > { %1919 = shalt.err (!%p1916_p3)
}
  0x32   : > { %s1920_s11 = scalar_lea.vmem %s2140_s14, 8192  ;;  %p1928_p12 = scmp.lt.s32.totalorder %s2140_s14, %s2140_s14 }
  0x33   : > { %p1921_p5 = scmp.ne.s32.totalorder %s2140_s14, %s1920_s11  ;;  %p1929_p0 = scmp.lt.s32.totalorder %s1920_s11, %s1920_s11 }
  0x35   : > { %p1923_p7 = pnand %p1921_p5, %p1881_p13  ;;  %p1930_p2 = por %p1929_p0, %p1928_p12 }
  0x37   : > { %p1924_p9 = pneg %p1923_p7 }
  0x39   : > { %p1931_p1 = pnand %p1930_p2, %p1924_p9 }
  0x3b   : > { %1934 = shalt.err (!%p1931_p1)
}
  0x3c   : > { %s2041_s22 = smov 128   ;;  %s2042_s23 = smov 8  }
  0x3d   : > { %1630 = dma.hbm_to_vmem [thread:$0]  (!%p2136_p11), %s2359_s3, 8192, %s2140_s14, [#allocation6], %s2041_s22, %s2041_s22, %s2042_s23  }
  0x3e   : > { %s2195_s13 = sadd.s32 1, %s2035_s27   ;;  %s31_s16 = sadd.s32 1, %s2031_s26 }
  0x3f   : > { %s28_s15 = ssub.s32 %s2035_s27, %s2195_s13  ;;  %p38_p6 = scmp.ne.s32.totalorder %s2031_s26, %s2027_s25 }
  0x40   : > { %p29_p13 = scmp.eq.s32.totalorder %s28_s15, 0  ;;  %p39_p10 = scmp.eq.s32.totalorder %s2035_s27, 0 }
  0x41   : > { %p2371_p5 = scmp.eq.s32.totalorder %s2106_s28, 1  ;;  %p1641_p9 = scmp.lt.s32.totalorder %s2035_s27, 2 }
  0x42   : > { %s2204_s17 = scalar_select %p29_p13, %s2031_s26, %s31_s16  }
  0x43   : > { %p40_p3 = por %p39_p10, %p38_p6  ;;  %p2208_p7 = por %p2371_p5, %p38_p6 }
  0x44   : > { %s258_s12 = sand.u32 1, %s2031_s26   ;;  %s1610_s14 = sshll.u32 %s2035_s27, 8 }
  0x45   : > { %s2372_s18 = scalar_select %p2208_p7, 1, 0 }
  0x46   : > { %s1469_s19 = sshll.u32 %s258_s12, 4  ;;  %s2218_s11 = scalar_lea.hbm %s2356_s0, %s1610_s14 }
  0x47   : > { %s262_s22 = scalar_lea.vmem [#allocation2], %s1469_s19  ;;  %p2222_p11 = pnand %p1641_p9, %p40_p3 }
  0x48   : > { %s270_s23 = sshll.u32 %s262_s22, 4  ;;  %s259_s10 = scalar_lea.sflag [#allocation3], %s258_s12  ;;  %s2220_s23 = int_to_ptr.vmem [resolvable:$true] %s270_s23 }
  0x49   : > { %s1935_s15 = scalar_lea.hbm %s2218_s11, 256  ;;  %p1937_p0 = pneg %p2222_p11 }
  0x4a   : > { %p1936_p12 = scmp.ne.s32.totalorder %s2218_s11, %s1935_s15  ;;  %s1940_s14 = scalar_lea.hbm %s2356_s0, 512 }
  0x4b   : > { %p1941_p13 = scmp.lt.u32.totalorder %s2218_s11, %s2356_s0  ;;  %p1942_p6 = scmp.lt.u32.totalorder %s1940_s14, %s1935_s15 }
  0x4c   : > { %p1938_p2 = pnand %p1937_p0, %p1936_p12  ;;  %p1944_p3 = scmp.lt.u32.totalorder %s1935_s15, %s2218_s11 }
  0x4d   : > { %p1943_p10 = por %p1942_p6, %p1941_p13 }
  0x4e   : > { %p1939_p1 = pneg %p1938_p2 }
  0x4f   : > { %p1945_p5 = por %p1944_p3, %p1943_p10 }
  0x51   : > { %p1946_p9 = pnand %p1945_p5, %p1939_p1 }
  0x53   : > { %1949 = shalt.err (!%p1946_p9)
}
  0x54   : > { %s1950_s12 = scalar_lea.vmem %s2220_s23, 256  ;;  %s2043_s22 = smov [#allocation2]  }
  0x55   : > { %p1951_p12 = scmp.ne.s32.totalorder %s2220_s23, %s1950_s12  ;;  %s1955_s16 = sshll.u32 %s2043_s22, 4  ;;  %s1956_s16 = int_to_ptr.vmem [resolvable:$false] %s1955_s16 }
  0x56   : > { %s1957_s19 = scalar_lea.vmem %s1956_s16, 512  ;;  %p1958_p4 = scmp.lt.s32.totalorder %s2220_s23, %s1956_s16 }
  0x57   : > { %p1953_p2 = pnand %p1951_p12, %p1937_p0  ;;  %p1959_p13 = scmp.lt.s32.totalorder %s1957_s19, %s1950_s12 }
  0x59   : > { %p1954_p7 = pneg %p1953_p2  ;;  %p1960_p6 = por %p1959_p13, %p1958_p4 }
  0x5b   : > { %p1961_p10 = pnand %p1960_p6, %p1954_p7 }
  0x5d   : > { %1964 = shalt.err (!%p1961_p10)
}
  0x5e   : > { %1634 = dma.hbm_to_vmem [thread:$0]  (!%p2222_p11), %s2218_s11, 256, %s2220_s23, %s259_s10  }
  0x5f   : > { %279 = sbr.rel (%p2125_p8) target bundleno = 952 (0x3b8), region = 48  ;;  %s2254_s15 = sand.u32 (!%p2125_p8), 1, %s2027_s25  }
  0x60   : > { %s1473_s14 = sshll.u32 (!%p2125_p8), %s2254_s15, 4  ;;  %s282_s20 = scalar_lea.sflag (!%p2125_p8), [#allocation3], %s2254_s15 }
  0x61   : > { %s2260_s21 = scalar_lea.vmem (!%p2125_p8), [#allocation2], %s1473_s14  ;;  %p2374_p4 = scmp.ne.s32.totalorder (!%p2125_p8), %s2367_s30, 0 }
  0x66   : > { %2010 = dma.done.wait (%p2374_p4), %s282_s20, 256  }
  0x67   : > { %2012 = vsyncadd (%p2374_p4), %s282_s20, 4294967040  ;;  %p2375_p7 = scmp.eq.s32.totalorder %s2106_s28, 0 }
  0x69   : > { %2014 = dma.done.wait (%p2375_p7), [#allocation6], 16384   ;;  %p2376_p8 = pmov %p2375_p7 }
  0x6a   : > { %v1683_v0 = vld [vmem:[#allocation5 + $0x4] ss:$16 sps:$4 sm:$0xff]   ;;  %v1685_v1 = vld [vmem:[#allocation5 + $0xc] ss:$16 sps:$4 sm:$0xff]   ;;  %v1687_v2 = vld [vmem:[#allocation5] ss:$16 sps:$4 sm:$0xff]  }
  0x6b   : > { %2016 = vsyncadd (%p2376_p8), [#allocation6], 4294950912  ;;  %734 = vmatprep.subr.bf16.mxu0 %v1683_v0  ;;  %v1688_v3 = vld [vmem:[#allocation5 + $0x8] ss:$16 sps:$4 sm:$0xff]   ;;  %775 = vmatprep.subr.bf16.mxu1 %v1685_v1  ;;  %v1689_v4 = vld [vmem:[#allocation5 + $0x24] ss:$16 sps:$4 sm:$0xff]  }
  0x6c   : > { %735 = vmatpush1.bf16.msra.mxu0 %v1687_v2  ;;  %776 = vmatpush1.bf16.msra.mxu1 %v1688_v3  ;;  %v1691_v5 = vld [vmem:[#allocation5 + $0x2c] ss:$16 sps:$4 sm:$0xff]   ;;  %v1693_v6 = vld [vmem:[#allocation5 + $0x20] ss:$16 sps:$4 sm:$0xff]   ;;  %v1694_v7 = vld [vmem:[#allocation5 + $0x28] ss:$16 sps:$4 sm:$0xff]  }
  0x6d   : > { %736 = vmatprep.subr.bf16.mxu0 %v1689_v4  ;;  %777 = vmatprep.subr.bf16.mxu1 %v1691_v5  ;;  %v1695_v8 = vld [vmem:[#allocation5 + $0x44] ss:$16 sps:$4 sm:$0xff]   ;;  %v1697_v9 = vld [vmem:[#allocation5 + $0x4c] ss:$16 sps:$4 sm:$0xff]   ;;  %v1699_v10 = vld [vmem:[#allocation5 + $0x40] ss:$16 sps:$4 sm:$0xff]  }
  0x6e   : > { %v1700_v11 = vld [vmem:[#allocation5 + $0x48] ss:$16 sps:$4 sm:$0xff]   ;;  %v1701_v12 = vld [vmem:[#allocation5 + $0x64] ss:$16 sps:$4 sm:$0xff]   ;;  %v1703_v13 = vld [vmem:[#allocation5 + $0x6c] ss:$16 sps:$4 sm:$0xff]  }
  0x6f   : > { %v1705_v14 = vld [vmem:[#allocation5 + $0x60] ss:$16 sps:$4 sm:$0xff]   ;;  %v1706_v15 = vld [vmem:[#allocation5 + $0x68] ss:$16 sps:$4 sm:$0xff]   ;;  %v1707_v16 = vld [vmem:[#allocation5 + $0x84] ss:$16 sps:$4 sm:$0xff]  }
  0x70   : > { %737 = vmatpush1.bf16.msra.mxu0 %v1693_v6  ;;  %778 = vmatpush1.bf16.msra.mxu1 %v1694_v7  ;;  %v1709_v17 = vld [vmem:[#allocation5 + $0x8c] ss:$16 sps:$4 sm:$0xff]   ;;  %v1711_v18 = vld [vmem:[#allocation5 + $0x80] ss:$16 sps:$4 sm:$0xff]   ;;  %v1712_v19 = vld [vmem:[#allocation5 + $0x88] ss:$16 sps:$4 sm:$0xff]  }
  0x71   : > { %738 = vmatprep.subr.bf16.mxu0 %v1695_v8  ;;  %779 = vmatprep.subr.bf16.mxu1 %v1697_v9  ;;  %v1713_v20 = vld [vmem:[#allocation5 + $0xa4] ss:$16 sps:$4 sm:$0xff]   ;;  %v1715_v21 = vld [vmem:[#allocation5 + $0xac] ss:$16 sps:$4 sm:$0xff]   ;;  %v1717_v22 = vld [vmem:[#allocation5 + $0xa0] ss:$16 sps:$4 sm:$0xff]  }
  0x72   : > { %v1718_v23 = vld [vmem:[#allocation5 + $0xa8] ss:$16 sps:$4 sm:$0xff]   ;;  %v1719_v24 = vld [vmem:[#allocation5 + $0xc4] ss:$16 sps:$4 sm:$0xff]   ;;  %v1721_v25 = vld [vmem:[#allocation5 + $0xcc] ss:$16 sps:$4 sm:$0xff]  }
  0x73   : > { %v1723_v26 = vld [vmem:[#allocation5 + $0xc0] ss:$16 sps:$4 sm:$0xff]   ;;  %v1724_v27 = vld [vmem:[#allocation5 + $0xc8] ss:$16 sps:$4 sm:$0xff]   ;;  %v1725_v28 = vld [vmem:[#allocation5 + $0xe4] ss:$16 sps:$4 sm:$0xff]  }
  0x74   : > { %739 = vmatpush1.bf16.msra.mxu0 %v1699_v10  ;;  %780 = vmatpush1.bf16.msra.mxu1 %v1700_v11  ;;  %v1727_v29 = vld [vmem:[#allocation5 + $0xec] ss:$16 sps:$4 sm:$0xff]   ;;  %v1729_v30 = vld [vmem:[#allocation5 + $0xe0] ss:$16 sps:$4 sm:$0xff]   ;;  %v1730_v31 = vld [vmem:[#allocation5 + $0xe8] ss:$16 sps:$4 sm:$0xff]  }
  0x75   : > { %740 = vmatprep.subr.bf16.mxu0 %v1701_v12  ;;  %781 = vmatprep.subr.bf16.mxu1 %v1703_v13  ;;  %v1731_v32 = vld [vmem:[#allocation5 + $0x104] ss:$16 sps:$4 sm:$0xff]   ;;  %v1733_v33 = vld [vmem:[#allocation5 + $0x10c] ss:$16 sps:$4 sm:$0xff]   ;;  %v1735_v34 = vld [vmem:[#allocation5 + $0x100] ss:$16 sps:$4 sm:$0xff]  }
  0x76   : > { %v1736_v35 = vld [vmem:[#allocation5 + $0x108] ss:$16 sps:$4 sm:$0xff]   ;;  %v1737_v36 = vld [vmem:[#allocation5 + $0x124] ss:$16 sps:$4 sm:$0xff]   ;;  %v1739_v37 = vld [vmem:[#allocation5 + $0x12c] ss:$16 sps:$4 sm:$0xff]  }
  0x77   : > { %v1741_v38 = vld [vmem:[#allocation5 + $0x120] ss:$16 sps:$4 sm:$0xff]   ;;  %v1742_v39 = vld [vmem:[#allocation5 + $0x128] ss:$16 sps:$4 sm:$0xff]   ;;  %v1743_v40 = vld [vmem:[#allocation5 + $0x144] ss:$16 sps:$4 sm:$0xff]  }
  0x78   : > { %741 = vmatpush1.bf16.msra.mxu0 %v1705_v14  ;;  %782 = vmatpush1.bf16.msra.mxu1 %v1706_v15  ;;  %v1745_v41 = vld [vmem:[#allocation5 + $0x14c] ss:$16 sps:$4 sm:$0xff]   ;;  %v1747_v42 = vld [vmem:[#allocation5 + $0x140] ss:$16 sps:$4 sm:$0xff]   ;;  %v1748_v43 = vld [vmem:[#allocation5 + $0x148] ss:$16 sps:$4 sm:$0xff]  }
  0x79   : > { %742 = vmatprep.subr.bf16.mxu0 %v1707_v16  ;;  %783 = vmatprep.subr.bf16.mxu1 %v1709_v17  ;;  %v1749_v44 = vld [vmem:[#allocation5 + $0x164] ss:$16 sps:$4 sm:$0xff]   ;;  %v1751_v45 = vld [vmem:[#allocation5 + $0x16c] ss:$16 sps:$4 sm:$0xff]   ;;  %v1753_v48 = vld [vmem:[#allocation5 + $0x160] ss:$16 sps:$4 sm:$0xff]  }
  0x7a   : > { %v2271_v46 = vld [vmem:[%s2260_s21 + $0x8] sm:$0xff]  ;;  %v1755_v50 = vld [vmem:[#allocation5 + $0x184] ss:$16 sps:$4 sm:$0xff]   ;;  %v1759_v52 = vld [vmem:[#allocation5 + $0x180] ss:$16 sps:$4 sm:$0xff]   ;;  %s1611_s16 = sshll.u32 %s2106_s28, 8 }
  0x7b   : > { %v327_v47 = vpack.c.bf16 %v2271_v46, %v2271_v46  ;;  %v1754_v49 = vld [vmem:[#allocation5 + $0x168] ss:$16 sps:$4 sm:$0xff]   ;;  %v1757_v51 = vld [vmem:[#allocation5 + $0x18c] ss:$16 sps:$4 sm:$0xff]   ;;  %v1761_v54 = vld [vmem:[#allocation5 + $0x1a4] ss:$16 sps:$4 sm:$0xff]   ;;  %s2312_s9 = scalar_lea.hbm %s2363_s7, %s1611_s16 }
  0x7c   : > { %743 = vmatpush1.bf16.msra.mxu0 %v1711_v18  ;;  %784 = vmatpush1.bf16.msra.mxu1 %v1712_v19  ;;  %v1760_v53 = vld [vmem:[#allocation5 + $0x188] ss:$16 sps:$4 sm:$0xff]   ;;  %v1763_v55 = vld [vmem:[#allocation5 + $0x1ac] ss:$16 sps:$4 sm:$0xff]   ;;  %v1765_v56 = vld [vmem:[#allocation5 + $0x1a0] ss:$16 sps:$4 sm:$0xff]  }
  0x7d   : > { %744 = vmatprep.subr.bf16.mxu0 %v1713_v20  ;;  %785 = vmatprep.subr.bf16.mxu1 %v1715_v21  ;;  %v1766_v57 = vld [vmem:[#allocation5 + $0x1a8] ss:$16 sps:$4 sm:$0xff]   ;;  %v1767_v58 = vld [vmem:[#allocation5 + $0x1c4] ss:$16 sps:$4 sm:$0xff]   ;;  %v1769_v59 = vld [vmem:[#allocation5 + $0x1cc] ss:$16 sps:$4 sm:$0xff]  }
  0x7e   : > { %766 = vmatprep.mubr.bf16.mxu0 %v327_v47  ;;  %807 = vmatprep.mubr.bf16.mxu1 %v327_v47  ;;  %v1771_v60 = vld [vmem:[#allocation5 + $0x1c0] ss:$16 sps:$4 sm:$0xff]   ;;  %v1772_v61 = vld [vmem:[#allocation5 + $0x1c8] ss:$16 sps:$4 sm:$0xff]   ;;  %v1773_v62 = vld [vmem:[#allocation5 + $0x1e4] ss:$16 sps:$4 sm:$0xff]  }
  0x7f   : > { %v1775_v63 = vld [vmem:[#allocation5 + $0x1ec] ss:$16 sps:$4 sm:$0xff]   ;;  %v1777_v0 = vld [vmem:[#allocation5 + $0x1e0] ss:$16 sps:$4 sm:$0xff]   ;;  %v1778_v1 = vld [vmem:[#allocation5 + $0x1e8] ss:$16 sps:$4 sm:$0xff]  }
  0x80   : > { %745 = vmatpush1.bf16.msra.mxu0 %v1717_v22  ;;  %786 = vmatpush1.bf16.msra.mxu1 %v1718_v23  ;;  %v2276_v2 = vld [vmem:[%s2260_s21] sm:$0xff]  ;;  %s323_s19 = scalar_lea.vmem [#allocation8], %s1473_s14  ;;  %s1361_s28 = scalar_lea.sflag [#allocation4], %s2254_s15 }
  0x81   : > { %746 = vmatprep.subr.bf16.mxu0 %v1719_v24  ;;  %787 = vmatprep.subr.bf16.mxu1 %v1721_v25  ;;  %v1781_v3 = vld [vmem:[#allocation7 + $0x4] ss:$8 sps:$4 sm:$0xff]   ;;  %v326_v5 = vpack.c.bf16 %v2276_v2, %v2276_v2  ;;  %v1779_v6 = vld [vmem:[#allocation7] ss:$8 sps:$4 sm:$0xff]   ;;  %v1787_v8 = vld [vmem:[#allocation7 + $0x14] ss:$8 sps:$4 sm:$0xff]  }
  0x82   : > { %v1784_v4 = vld [vmem:[#allocation7 + $0x104] ss:$8 sps:$4 sm:$0xff]   ;;  %v1782_v7 = vld [vmem:[#allocation7 + $0x100] ss:$8 sps:$4 sm:$0xff]   ;;  %v1790_v9 = vld [vmem:[#allocation7 + $0x114] ss:$8 sps:$4 sm:$0xff]  }
  0x83   : > { %v1785_v10 = vld [vmem:[#allocation7 + $0x10] ss:$8 sps:$4 sm:$0xff]   ;;  %v1793_v12 = vld [vmem:[#allocation7 + $0x24] ss:$8 sps:$4 sm:$0xff]   ;;  %v1791_v14 = vld [vmem:[#allocation7 + $0x20] ss:$8 sps:$4 sm:$0xff]  }
  0x84   : > { %747 = vmatpush1.bf16.msra.mxu0 %v1723_v26  ;;  %788 = vmatpush1.bf16.msra.mxu1 %v1724_v27  ;;  %v1788_v11 = vld [vmem:[#allocation7 + $0x110] ss:$8 sps:$4 sm:$0xff]   ;;  %v1796_v13 = vld [vmem:[#allocation7 + $0x124] ss:$8 sps:$4 sm:$0xff]   ;;  %v1794_v15 = vld [vmem:[#allocation7 + $0x120] ss:$8 sps:$4 sm:$0xff]  }
  0x85   : > { %748 = vmatprep.subr.bf16.mxu0 %v1725_v28  ;;  %789 = vmatprep.subr.bf16.mxu1 %v1727_v29  ;;  %v1799_v16 = vld [vmem:[#allocation7 + $0x34] ss:$8 sps:$4 sm:$0xff]   ;;  %v1797_v18 = vld [vmem:[#allocation7 + $0x30] ss:$8 sps:$4 sm:$0xff]   ;;  %v1805_v20 = vld [vmem:[#allocation7 + $0x44] ss:$8 sps:$4 sm:$0xff]  }
  0x86   : > { %v1802_v17 = vld [vmem:[#allocation7 + $0x134] ss:$8 sps:$4 sm:$0xff]   ;;  %v1800_v19 = vld [vmem:[#allocation7 + $0x130] ss:$8 sps:$4 sm:$0xff]   ;;  %v1808_v21 = vld [vmem:[#allocation7 + $0x144] ss:$8 sps:$4 sm:$0xff]  }
  0x87   : > { %v1803_v22 = vld [vmem:[#allocation7 + $0x40] ss:$8 sps:$4 sm:$0xff]   ;;  %v1811_v24 = vld [vmem:[#allocation7 + $0x54] ss:$8 sps:$4 sm:$0xff]   ;;  %v1809_v26 = vld [vmem:[#allocation7 + $0x50] ss:$8 sps:$4 sm:$0xff]  }
  0x88   : > { %749 = vmatpush1.bf16.msra.mxu0 %v1729_v30  ;;  %790 = vmatpush1.bf16.msra.mxu1 %v1730_v31  ;;  %v1806_v23 = vld [vmem:[#allocation7 + $0x140] ss:$8 sps:$4 sm:$0xff]   ;;  %v1814_v25 = vld [vmem:[#allocation7 + $0x154] ss:$8 sps:$4 sm:$0xff]   ;;  %v1812_v27 = vld [vmem:[#allocation7 + $0x150] ss:$8 sps:$4 sm:$0xff]  }
  0x89   : > { %750 = vmatprep.subr.bf16.mxu0 %v1731_v32  ;;  %791 = vmatprep.subr.bf16.mxu1 %v1733_v33  ;;  %v1817_v28 = vld [vmem:[#allocation7 + $0x64] ss:$8 sps:$4 sm:$0xff]   ;;  %v1815_v30 = vld [vmem:[#allocation7 + $0x60] ss:$8 sps:$4 sm:$0xff]   ;;  %v1823_v32 = vld [vmem:[#allocation7 + $0x74] ss:$8 sps:$4 sm:$0xff]  }
  0x8a   : > { %v1820_v29 = vld [vmem:[#allocation7 + $0x164] ss:$8 sps:$4 sm:$0xff]   ;;  %v1818_v31 = vld [vmem:[#allocation7 + $0x160] ss:$8 sps:$4 sm:$0xff]   ;;  %v1826_v33 = vld [vmem:[#allocation7 + $0x174] ss:$8 sps:$4 sm:$0xff]  }
  0x8b   : > { %v1839_v47 = vld [vmem:[#allocation7 + $0xa0] ss:$8 sps:$4 sm:$0xff]   ;;  %s1375_s20 = sshll.u32 %s323_s19, 4  ;;  %p2377_p0 = scmp.ne.s32.totalorder %s2372_s18, 0  ;;  %s2314_s20 = int_to_ptr.vmem [resolvable:$true] %s1375_s20 }
  0x8c   : > { %751 = vmatpush1.bf16.msra.mxu0 %v1735_v34  ;;  %792 = vmatpush1.bf16.msra.mxu1 %v1736_v35  ;;  %v1821_v34 = vld [vmem:[#allocation7 + $0x70] ss:$8 sps:$4 sm:$0xff]   ;;  %s1965_s11 = scalar_lea.vmem %s2314_s20, 256  ;;  %s2044_s14 = smov [#allocation8]  }
  0x8d   : > { %752 = vmatprep.subr.bf16.mxu0 %v1737_v36  ;;  %793 = vmatprep.subr.bf16.mxu1 %v1739_v37  ;;  %v1824_v35 = vld [vmem:[#allocation7 + $0x170] ss:$8 sps:$4 sm:$0xff]   ;;  %v1829_v36 = vld [vmem:[#allocation7 + $0x84] ss:$8 sps:$4 sm:$0xff]   ;;  %p1966_p11 = scmp.ne.s32.totalorder %s2314_s20, %s1965_s11  ;;  %s1969_s23 = sshll.u32 %s2044_s14, 4  ;;  %s1970_s23 = int_to_ptr.vmem [resolvable:$false] %s1969_s23 }
  0x8e   : > { %v1832_v37 = vld [vmem:[#allocation7 + $0x184] ss:$8 sps:$4 sm:$0xff]   ;;  %s1971_s29 = scalar_lea.vmem %s1970_s23, 512  ;;  %p1972_p5 = scmp.lt.s32.totalorder %s2314_s20, %s1970_s23 }
  0x8f   : > { %p1967_p1 = pnand %p1966_p11, %p2377_p0  ;;  %p1973_p9 = scmp.lt.s32.totalorder %s1971_s29, %s1965_s11 }
  0x90   : > { %753 = vmatpush1.bf16.msra.mxu0 %v1741_v38  ;;  %794 = vmatpush1.bf16.msra.mxu1 %v1742_v39  ;;  %v1827_v38 = vld [vmem:[#allocation7 + $0x80] ss:$8 sps:$4 sm:$0xff]  }
  0x91   : > { %754 = vmatprep.subr.bf16.mxu0 %v1743_v40  ;;  %795 = vmatprep.subr.bf16.mxu1 %v1745_v41  ;;  %v1830_v39 = vld [vmem:[#allocation7 + $0x180] ss:$8 sps:$4 sm:$0xff]   ;;  %v1835_v40 = vld [vmem:[#allocation7 + $0x94] ss:$8 sps:$4 sm:$0xff]   ;;  %p1968_p3 = pneg %p1967_p1  ;;  %p1974_p12 = por %p1973_p9, %p1972_p5 }
  0x92   : > { %v1838_v41 = vld [vmem:[#allocation7 + $0x194] ss:$8 sps:$4 sm:$0xff]  }
  0x93   : > { %p1975_p2 = pnand %p1974_p12, %p1968_p3 }
  0x94   : > { %755 = vmatpush1.bf16.msra.mxu0 %v1747_v42  ;;  %796 = vmatpush1.bf16.msra.mxu1 %v1748_v43  ;;  %v1833_v42 = vld [vmem:[#allocation7 + $0x90] ss:$8 sps:$4 sm:$0xff]  }
  0x95   : > { %756 = vmatprep.subr.bf16.mxu0 %v1749_v44  ;;  %797 = vmatprep.subr.bf16.mxu1 %v1751_v45  ;;  %v1836_v43 = vld [vmem:[#allocation7 + $0x190] ss:$8 sps:$4 sm:$0xff]   ;;  %v1841_v44 = vld [vmem:[#allocation7 + $0xa4] ss:$8 sps:$4 sm:$0xff]  }
  0x96   : > { %v1844_v45 = vld [vmem:[#allocation7 + $0x1a4] ss:$8 sps:$4 sm:$0xff]  }
  0x98   : > { %757 = vmatpush1.bf16.msra.mxu0 %v1753_v48  ;;  %798 = vmatpush1.bf16.msra.mxu1 %v1754_v49  ;;  %v1842_v48 = vld [vmem:[#allocation7 + $0x1a0] ss:$8 sps:$4 sm:$0xff]   ;;  %v1847_v49 = vld [vmem:[#allocation7 + $0xb4] ss:$8 sps:$4 sm:$0xff]  }
  0x99   : > { %758 = vmatprep.subr.bf16.mxu0 %v1755_v50  ;;  %799 = vmatprep.subr.bf16.mxu1 %v1757_v51  ;;  %v1850_v50 = vld [vmem:[#allocation7 + $0x1b4] ss:$8 sps:$4 sm:$0xff]   ;;  %v1845_v51 = vld [vmem:[#allocation7 + $0xb0] ss:$8 sps:$4 sm:$0xff]  }
  0x9c   : > { %759 = vmatpush1.bf16.msra.mxu0 %v1759_v52  ;;  %800 = vmatpush1.bf16.msra.mxu1 %v1760_v53  ;;  %v1848_v52 = vld [vmem:[#allocation7 + $0x1b0] ss:$8 sps:$4 sm:$0xff]   ;;  %v1853_v53 = vld [vmem:[#allocation7 + $0xc4] ss:$8 sps:$4 sm:$0xff]  }
  0x9d   : > { %760 = vmatprep.subr.bf16.mxu0 %v1761_v54  ;;  %801 = vmatprep.subr.bf16.mxu1 %v1763_v55  ;;  %v1856_v54 = vld [vmem:[#allocation7 + $0x1c4] ss:$8 sps:$4 sm:$0xff]   ;;  %v1851_v55 = vld [vmem:[#allocation7 + $0xc0] ss:$8 sps:$4 sm:$0xff]  }
  0xa0   : > { %761 = vmatpush1.bf16.msra.mxu0 %v1765_v56  ;;  %802 = vmatpush1.bf16.msra.mxu1 %v1766_v57  ;;  %v1854_v56 = vld [vmem:[#allocation7 + $0x1c0] ss:$8 sps:$4 sm:$0xff]   ;;  %v1859_v57 = vld [vmem:[#allocation7 + $0xd4] ss:$8 sps:$4 sm:$0xff]  }
  0xa1   : > { %762 = vmatprep.subr.bf16.mxu0 %v1767_v58  ;;  %803 = vmatprep.subr.bf16.mxu1 %v1769_v59  ;;  %v1862_v58 = vld [vmem:[#allocation7 + $0x1d4] ss:$8 sps:$4 sm:$0xff]   ;;  %v1857_v59 = vld [vmem:[#allocation7 + $0xd0] ss:$8 sps:$4 sm:$0xff]  }
  0xa4   : > { %763 = vmatpush1.bf16.msra.mxu0 %v1771_v60  ;;  %804 = vmatpush1.bf16.msra.mxu1 %v1772_v61  ;;  %v1860_v60 = vld [vmem:[#allocation7 + $0x1d0] ss:$8 sps:$4 sm:$0xff]   ;;  %v1865_v61 = vld [vmem:[#allocation7 + $0xe4] ss:$8 sps:$4 sm:$0xff]  }
  0xa5   : > { %764 = vmatprep.subr.bf16.mxu0 %v1773_v62  ;;  %805 = vmatprep.subr.bf16.mxu1 %v1775_v63  ;;  %v1868_v62 = vld [vmem:[#allocation7 + $0x1e4] ss:$8 sps:$4 sm:$0xff]   ;;  %v1863_v63 = vld [vmem:[#allocation7 + $0xe0] ss:$8 sps:$4 sm:$0xff]  }
  0xa8   : > { %765 = vmatpush1.bf16.msra.mxu0 %v1777_v0  ;;  %806 = vmatpush1.bf16.msra.mxu1 %v1778_v1  ;;  %v1866_v0 = vld [vmem:[#allocation7 + $0x1e0] ss:$8 sps:$4 sm:$0xff]   ;;  %v1871_v1 = vld [vmem:[#allocation7 + $0xf4] ss:$8 sps:$4 sm:$0xff]  }
  0xa9   : > { %1208 = vmatprep.subr.bf16.mxu0 %v1781_v3  ;;  %1249 = vmatprep.subr.bf16.mxu1 %v1784_v4  ;;  %v1874_v3 = vld [vmem:[#allocation7 + $0x1f4] ss:$8 sps:$4 sm:$0xff]   ;;  %v1869_v4 = vld [vmem:[#allocation7 + $0xf0] ss:$8 sps:$4 sm:$0xff]  }
  0xab   : > { %767 = vmatmul.mubr.bf16.vlgmr.msra.gmra.mrb[0].mxu0 %v326_v5  ;;  %808 = vmatmul.mubr.bf16.vlgmr.msra.gmra.mrb[0].mxu1 %v326_v5  ;;  %v1872_v5 = vld [vmem:[#allocation7 + $0x1f0] ss:$8 sps:$4 sm:$0xff]  }
  0xac   : > { %1209 = vmatpush1.bf16.msra.mxu0 %v1779_v6  ;;  %1250 = vmatpush1.bf16.msra.mxu1 %v1782_v7  ;;  %v394_v6 = vlaneseq }
  0xad   : > { %1210 = vmatprep.subr.bf16.mxu0 %v1787_v8  ;;  %1251 = vmatprep.subr.bf16.mxu1 %v1790_v9 }
  0xae   : > { %v395_v7 = vshrl.u32 %v394_v6, 7  ;;  %v1306_v6 = vld [vmem:[%s2361_s5] sm:$0x3] }
  0xb0   : > { %1211 = vmatpush1.bf16.msra.mxu0 %v1785_v10  ;;  %1252 = vmatpush1.bf16.msra.mxu1 %v1788_v11  ;;  %v2280_v8 = vsub.s32 0, %v395_v7  ;;  %v404_v9 = vsub.s32 2, %v395_v7  ;;  %v392_v10 = vld [vmem:[%s2358_s2] sm:$0xf]  ;;  %v2285_v11 = vsub.s32 1, %v395_v7 }
  0xb1   : > { %1212 = vmatprep.subr.bf16.mxu0 %v1793_v12  ;;  %1253 = vmatprep.subr.bf16.mxu1 %v1796_v13  ;;  %v408_v12 = vsub.s32 3, %v395_v7 }
  0xb2   : > { %v397_v13 = vrot.slane %v392_v10, %v2280_v8  ;;  %v1334_v7 = vrot.slane %v1306_v6, %v2280_v8 }
  0xb4   : > { %1213 = vmatpush1.bf16.msra.mxu0 %v1791_v14  ;;  %1254 = vmatpush1.bf16.msra.mxu1 %v1794_v15  ;;  %v405_v14 = vrot.slane %v392_v10, %v404_v9  ;;  %v401_v15 = vrot.slane %v392_v10, %v2285_v11  ;;  %v1338_v9 = vrot.slane %v1306_v6, %v2285_v11 }
  0xb5   : > { %1214 = vmatprep.subr.bf16.mxu0 %v1799_v16  ;;  %1255 = vmatprep.subr.bf16.mxu1 %v1802_v17  ;;  %v409_v16 = vrot.slane %v392_v10, %v408_v12  ;;  %v1307_v10 = vld [vmem:[%s2362_s6] sm:$0x3] }
  0xb8   : > { %1215 = vmatpush1.bf16.msra.mxu0 %v1797_v18  ;;  %1256 = vmatpush1.bf16.msra.mxu1 %v1800_v19 }
  0xb9   : > { %1216 = vmatprep.subr.bf16.mxu0 %v1805_v20  ;;  %1257 = vmatprep.subr.bf16.mxu1 %v1808_v21 }
  0xbc   : > { %1217 = vmatpush1.bf16.msra.mxu0 %v1803_v22  ;;  %1258 = vmatpush1.bf16.msra.mxu1 %v1806_v23 }
  0xbd   : > { %1218 = vmatprep.subr.bf16.mxu0 %v1811_v24  ;;  %1259 = vmatprep.subr.bf16.mxu1 %v1814_v25 }
  0xc0   : > { %1219 = vmatpush1.bf16.msra.mxu0 %v1809_v26  ;;  %1260 = vmatpush1.bf16.msra.mxu1 %v1812_v27 }
  0xc1   : > { %1220 = vmatprep.subr.bf16.mxu0 %v1817_v28  ;;  %1261 = vmatprep.subr.bf16.mxu1 %v1820_v29 }
  0xc4   : > { %1221 = vmatpush1.bf16.msra.mxu0 %v1815_v30  ;;  %1262 = vmatpush1.bf16.msra.mxu1 %v1818_v31 }
  0xc5   : > { %1222 = vmatprep.subr.bf16.mxu0 %v1823_v32  ;;  %1263 = vmatprep.subr.bf16.mxu1 %v1826_v33 }
  0xc8   : > { %1223 = vmatpush1.bf16.msra.mxu0 %v1821_v34  ;;  %1264 = vmatpush1.bf16.msra.mxu1 %v1824_v35 }
  0xc9   : > { %1224 = vmatprep.subr.bf16.mxu0 %v1829_v36  ;;  %1265 = vmatprep.subr.bf16.mxu1 %v1832_v37  ;;  %v1292_v37 = vld [vmem:[%s2360_s4] sm:$0x3] }
  0xcc   : > { %1225 = vmatpush1.bf16.msra.mxu0 %v1827_v38  ;;  %1266 = vmatpush1.bf16.msra.mxu1 %v1830_v39 }
  0xcd   : > { %1226 = vmatprep.subr.bf16.mxu0 %v1835_v40  ;;  %1267 = vmatprep.subr.bf16.mxu1 %v1838_v41 }
  0xd0   : > { %1227 = vmatpush1.bf16.msra.mxu0 %v1833_v42  ;;  %1268 = vmatpush1.bf16.msra.mxu1 %v1836_v43  ;;  %v1297_v43 = vrot.slane %v1292_v37, %v2280_v8 }
  0xd1   : > { %1228 = vmatprep.subr.bf16.mxu0 %v1841_v44  ;;  %1269 = vmatprep.subr.bf16.mxu1 %v1844_v45 }
  0xd4   : > { %1229 = vmatpush1.bf16.msra.mxu0 %v1839_v47  ;;  %1270 = vmatpush1.bf16.msra.mxu1 %v1842_v48  ;;  %v1301_v48 = vrot.slane %v1292_v37, %v2285_v11 }
  0xd5   : > { %1230 = vmatprep.subr.bf16.mxu0 %v1847_v49  ;;  %1271 = vmatprep.subr.bf16.mxu1 %v1850_v50 }
  0xd8   : > { %1231 = vmatpush1.bf16.msra.mxu0 %v1845_v51  ;;  %1272 = vmatpush1.bf16.msra.mxu1 %v1848_v52 }
  0xd9   : > { %1232 = vmatprep.subr.bf16.mxu0 %v1853_v53  ;;  %1273 = vmatprep.subr.bf16.mxu1 %v1856_v54 }
  0xdc   : > { %1233 = vmatpush1.bf16.msra.mxu0 %v1851_v55  ;;  %1274 = vmatpush1.bf16.msra.mxu1 %v1854_v56 }
  0xdd   : > { %1234 = vmatprep.subr.bf16.mxu0 %v1859_v57  ;;  %1275 = vmatprep.subr.bf16.mxu1 %v1862_v58 }
  0xe0   : > { %1235 = vmatpush1.bf16.msra.mxu0 %v1857_v59  ;;  %1276 = vmatpush1.bf16.msra.mxu1 %v1860_v60 }
  0xe1   : > { %1236 = vmatprep.subr.bf16.mxu0 %v1865_v61  ;;  %1277 = vmatprep.subr.bf16.mxu1 %v1868_v62 }
  0xe4   : > { %1237 = vmatpush1.bf16.msra.mxu0 %v1863_v63  ;;  %1278 = vmatpush1.bf16.msra.mxu1 %v1866_v0 }
  0xe5   : > { %1238 = vmatprep.subr.bf16.mxu0 %v1871_v1  ;;  %1279 = vmatprep.subr.bf16.mxu1 %v1874_v3 }
  0xe8   : > { %1239 = vmatpush1.bf16.msra.mxu0 %v1869_v4  ;;  %1280 = vmatpush1.bf16.msra.mxu1 %v1872_v5 }
 0x17e   : > { %v768_v17 = vpop.f32.mrb[0].mxu0  ;;  %v809_v18 = vpop.f32.mrb[0].mxu1 }
 0x17f   : > { %v769_v19 = vadd.f32 %v768_v17, %v397_v13  ;;  %v810_v20 = vadd.f32 %v809_v18, %v405_v14  ;;  %v770_v21 = vpop.f32.mrb[1].mxu0  ;;  %v811_v22 = vpop.f32.mrb[1].mxu1  ;;  %v1349_v14 = vrot.slane %v1307_v10, %v2280_v8 }
 0x180   : > { %v771_v23 = vadd.f32 %v770_v21, %v401_v15  ;;  %v812_v24 = vadd.f32 %v811_v22, %v409_v16  ;;  %v772_v25 = vpop.f32.mrb[2].mxu0  ;;  %v813_v26 = vpop.f32.mrb[2].mxu1  ;;  %v1353_v15 = vrot.slane %v1307_v10, %v2285_v11 }
 0x181   : > { %v816_v27 = vmax.f32 %v769_v19, 0.0  ;;  %v818_v28 = vmax.f32 %v810_v20, 0.0  ;;  %v773_v29 = vpop.f32.mrb[3].mxu0  ;;  %v814_v30 = vpop.f32.mrb[3].mxu1 }
 0x182   : > { %v817_v31 = vmax.f32 %v771_v23, 0.0  ;;  %v819_v32 = vmax.f32 %v812_v24, 0.0 }
 0x183   : > { %v820_v35 = vpack.c.bf16 %v816_v27, %v816_v27  ;;  %v822_v36 = vpack.c.bf16 %v818_v28, %v818_v28 }
 0x184   : > { %v821_v33 = vpack.c.bf16 %v817_v31, %v817_v31  ;;  %v823_v34 = vpack.c.bf16 %v819_v32, %v819_v32 }
 0x186   : > { %1240 = vmatprep.mubr.bf16.mxu0 %v821_v33  ;;  %1281 = vmatprep.mubr.bf16.mxu1 %v823_v34 }
 0x187   : > { %1241 = vmatmul.mubr.bf16.vlgmr.msra.gmra.mrb[4].mxu0 %v820_v35  ;;  %1282 = vmatmul.mubr.bf16.vlgmr.msra.gmra.mrb[4].mxu1 %v822_v36 }
 0x25a   : > { %v1242_v38 = vpop.f32.mrb[4].mxu0  ;;  %v1283_v39 = vpop.f32.mrb[4].mxu1 }
 0x25b   : > { %v1284_v40 = vadd.f32 %v1283_v39, %v1242_v38  ;;  %v1244_v41 = vpop.f32.mrb[5].mxu0  ;;  %v1285_v42 = vpop.f32.mrb[5].mxu1 }
 0x25c   : > { %v1286_v44 = vadd.f32 %v1285_v42, %v1244_v41  ;;  %v1246_v45 = vpop.f32.mrb[6].mxu0  ;;  %v1287_v47 = vpop.f32.mrb[6].mxu1 }
 0x25d   : > { %v1290_v49 = vadd.f32 %v1284_v40, %v2276_v2  ;;  %v1247_v50 = vpop.f32.mrb[7].mxu0  ;;  %v1288_v51 = vpop.f32.mrb[7].mxu1 }
 0x25e   : > { %v1291_v52 = vadd.f32 %v1286_v44, %v2271_v46 }
 0x25f   : > { %v1304_v53 = vadd.f32 %v1297_v43, %v1290_v49 }
 0x260   : > { %v1305_v54 = vadd.f32 %v1301_v48, %v1291_v52 }
 0x262   : > { %v1308_v55 = vadd.f32 %v1305_v54, %v1304_v53 }
 0x264   : > { %1309 = vadd.xlane.f32.xlu0 %v1308_v55 }
 0x2f1   : > { %v1310_v56 = vpop.xlane.xlu0 %1309 }
 0x2f2   : > { %v1312_v57 = vmul.f32 0.00390625, %v1310_v56 }
 0x2f4   : > { %v1313_v58 = vsub.f32 %v1304_v53, %v1312_v57  ;;  %v1314_v59 = vsub.f32 %v1305_v54, %v1312_v57 }
 0x2f6   : > { %v1315_v60 = vmul.f32 %v1313_v58, %v1313_v58  ;;  %v1316_v61 = vmul.f32 %v1314_v59, %v1314_v59  ;;  %v1341_v12 = vmul.f32 %v1334_v7, %v1313_v58  ;;  %v1342_v13 = vmul.f32 %v1338_v9, %v1314_v59 }
 0x2f8   : > { %v1317_v62 = vadd.f32 %v1316_v61, %v1315_v60 }
 0x2fa   : > { %1318 = vadd.xlane.f32.xlu0 %v1317_v62 }
 0x387   : > { %v1319_v63 = vpop.xlane.xlu0 %1318 }
 0x388   : > { %v1320_v0 = vmul.f32 0.003921569, %v1319_v63 }
 0x38a   : > { %1875 = vrsqrt.f32 %v1320_v0  ;;  %vm1323_vm0 = vcmp.eq.f32.partialorder %v1320_v0, inf  ;;  %v1326_v46 = vand.u32 2147483648, %v1320_v0  ;;  %vm1325_vm1 = vcmp.eq.f32.partialorder %v1320_v0, 0.0 }
 0x394   : > { %v1876_v2 = vpop.eup %1875 }
 0x395   : > { %v1322_v1 = vmul.f32 %v1876_v2, %v1320_v0 }
 0x397   : > { %v1324_v3 = vsel %vm1323_vm0, %v1320_v0, %v1322_v1 }
 0x398   : > { %v1327_v4 = vsel %vm1325_vm1, %v1326_v46, %v1324_v3 }
 0x399   : > { %v1328_v5 = vadd.f32 1e-06, %v1327_v4 }
 0x39b   : > { %1877 = vrcp.f32 %v1328_v5 }
 0x3a5   : > { %v1878_v16 = vpop.eup %1877 }
 0x3a6   : > { %v1343_v17 = vmul.f32 %v1878_v16, %v1341_v12  ;;  %v1344_v18 = vmul.f32 %v1878_v16, %v1342_v13 }
 0x3a8   : > { %v1356_v19 = vadd.f32 %v1349_v14, %v1343_v17  ;;  %v1357_v20 = vadd.f32 %v1353_v15, %v1344_v18 }
 0x3aa   : > { %1358 = vst [vmem:[%s323_s19] sm:$0xff] %v1356_v19  ;;  %1359 = vst [vmem:[%s323_s19 + $0x8] sm:$0xff] %v1357_v20 }
 0x3ab   : > { %1978 = shalt.err (!%p1975_p2)
}
 0x3ac   : > { %s1979_s15 = scalar_lea.hbm %s2312_s9, 256  ;;  %s1983_s22 = scalar_lea.hbm %s2363_s7, 512 }
 0x3ad   : > { %p1980_p13 = scmp.ne.s32.totalorder %s2312_s9, %s1979_s15  ;;  %p1984_p4 = scmp.lt.u32.totalorder %s2312_s9, %s2363_s7 }
 0x3ae   : > { %p1985_p7 = scmp.lt.u32.totalorder %s1983_s22, %s1979_s15  ;;  %p1987_p11 = scmp.lt.u32.totalorder %s1979_s15, %s2312_s9 }
 0x3af   : > { %p1981_p6 = pnand %p1980_p13, %p2377_p0 }
 0x3b0   : > { %p1986_p8 = por %p1985_p7, %p1984_p4 }
 0x3b1   : > { %p1982_p10 = pneg %p1981_p6 }
 0x3b2   : > { %p1988_p1 = por %p1987_p11, %p1986_p8 }
 0x3b4   : > { %p1989_p3 = pnand %p1988_p1, %p1982_p10 }
 0x3b6   : > { %1992 = shalt.err (!%p1989_p3)
}
 0x3b7   : > { %1622 = dma.vmem_to_hbm [thread:$0]  (%p2377_p0), %s2314_s20, 256, %s2312_s9, %s1361_s28  }
 0x3b8 PF: > { %s1387_s21 = sand.u32 1, %s2023_s24   ;;  %p2378_p5 = scmp.ne.s32.totalorder %s2368_s8, 0 }
 0x3b9   : > { %p2379_p9 = scmp.ge.s32.totalorder %s2035_s27, 2  ;;  %s1388_s30 = scalar_lea.sflag [#allocation4], %s1387_s21 }
 0x3bb   : > { %p1636_p12 = pnand %p2379_p9, %p2378_p5 }
 0x3bd   : > { %2018 = dma.done.wait (!%p1636_p12), %s1388_s30, 256  }
 0x3be   : > { %2020 = vsyncadd (!%p1636_p12), %s1388_s30, 4294967040  ;;  %p21_p2 = scmp.ge.s32.totalorder %s2195_s13, 4   ;;  %s2380_s24 = smov %s2027_s25 }
 0x3bf   : > { %s2381_s25 = smov %s2031_s26  ;;  %s2382_s26 = smov %s2204_s17 }
 0x3c0   : > { %s2383_s27 = smov %s2195_s13  ;;  %23 = sbr.rel (!%p21_p2) target bundleno = 6 (0x6), region = 101 }
 0x3c7   :  { %1393 = vsyncpa [#allocation3], 1 }
 0x3c8   :  { %1395 = vsyncpa [#allocation3 + $0x1], 1 }
 0x3c9   :  { %1396 = vsyncpa [#allocation6], 1 }
 0x3ca   :  { %1397 = vsyncpa [#allocation4], 1 }
 0x3cb   :  { %1399 = vsyncpa [#allocation4 + $0x1], 1 }

</bundles_post_ra>
